<compile_context>
chip_gen: v6e
topology: v6e:2x2x1
jax: 0.10.0
libtpu: 0.0.40
codegen_flags: <defaults>
</compile_context>

<pallas_src>
import functools
import numpy as np

import jax
import jax.numpy as jnp
from jax.experimental import pallas as pl
from jax.experimental.pallas import tpu as pltpu


# ----------------------------------------------------------------------------
# numerics helpers (usable inside kernels)
# ----------------------------------------------------------------------------
def _erf(x):
    # Abramowitz & Stegun 7.1.26 (|err| < 1.5e-7) built from Mosaic-lowering ops.
    a1, a2, a3, a4, a5 = (0.254829592, -0.284496736, 1.421413741,
                          -1.453152027, 1.061405429)
    p = 0.3275911
    s = jnp.where(x >= 0.0, 1.0, -1.0)
    ax = jnp.abs(x)
    t = 1.0 / (1.0 + p * ax)
    poly = ((((a5 * t + a4) * t + a3) * t + a2) * t + a1) * t
    return s * (1.0 - poly * jnp.exp(-ax * ax))


def _gelu(x):
    # matches torch.nn.GELU default (exact, erf-based)
    return x * 0.5 * (1.0 + _erf(x * (1.0 / np.sqrt(2.0))))


def _pick_tile(dim, pref, align):
    """Largest tile <= pref that divides dim and is a multiple of align,
    falling back to the full dim (always legal under the (8,128) rule)."""
    if dim <= pref:
        return dim
    t = (pref // align) * align
    while t >= align:
        if dim % t == 0:
            return t
        t -= align
    return dim


# ----------------------------------------------------------------------------
# Kernel 1: fused LayerNorm -> matmul (+bias)  [used for the QKV projection]
# ----------------------------------------------------------------------------
def _ln_matmul_kernel(x_ref, g_ref, b_ref, w_ref, bias_ref, o_ref, xln_sc, *, eps):
    # x: (tm, C) f32 | g,b: (1, C) | w: (C, tn) compute dtype | bias: (1, tn)
    @pl.when(pl.program_id(1) == 0)
    def _():
        x = x_ref[...]
        mu = jnp.mean(x, axis=-1, keepdims=True)
        xc = x - mu
        var = jnp.mean(xc * xc, axis=-1, keepdims=True)
        xn = xc * jax.lax.rsqrt(var + eps) * g_ref[...] + b_ref[...]
        xln_sc[...] = xn.astype(xln_sc.dtype)       # LN computed once per m-tile

    y = jnp.dot(xln_sc[...], w_ref[...], preferred_element_type=jnp.float32)
    o_ref[...] = (y + bias_ref[...]).astype(o_ref.dtype)


def ln_matmul(x, g, b, w, bias, out_dtype, eps=1e-5, tm_pref=256, tn_pref=512):
    M, C = x.shape
    N = w.shape[1]
    tm = _pick_tile(M, tm_pref, 8)
    tn = _pick_tile(N, tn_pref, 128)
    return pl.pallas_call(
        functools.partial(_ln_matmul_kernel, eps=eps),
        grid=(M // tm, N // tn),
        out_shape=jax.ShapeDtypeStruct((M, N), out_dtype),
        in_specs=[
            pl.BlockSpec((tm, C), lambda m, n: (m, 0)),
            pl.BlockSpec((1, C), lambda m, n: (0, 0)),
            pl.BlockSpec((1, C), lambda m, n: (0, 0)),
            pl.BlockSpec((C, tn), lambda m, n: (0, n)),
            pl.BlockSpec((1, tn), lambda m, n: (0, n)),
        ],
        out_specs=pl.BlockSpec((tm, tn), lambda m, n: (m, n)),
        scratch_shapes=[pltpu.VMEM((tm, C), w.dtype)],
        compiler_params=pltpu.CompilerParams(
            dimension_semantics=("parallel", "arbitrary")),
    )(x, g, b, w, bias)


# ----------------------------------------------------------------------------
# Kernel 2: flash-style attention (online softmax over KV tiles)
# ----------------------------------------------------------------------------
def _flash_attn_kernel(q_ref, k_ref, v_ref, o_ref, m_sc, l_sc, acc_sc, *, scale):
    kv = pl.program_id(1)

    @pl.when(kv == 0)
    def _():
        m_sc[...] = jnp.full_like(m_sc, -jnp.inf)
        l_sc[...] = jnp.zeros_like(l_sc)
        acc_sc[...] = jnp.zeros_like(acc_sc)

    # q/k/v blocks: (BH, tq/tk, Dh)
    s = jnp.einsum("bqd,bkd->bqk", q_ref[...], k_ref[...],
                   preferred_element_type=jnp.float32) * scale
    # TODO(synk): optional additive attention mask (mask=None in this block) not implemented.
    m_new = jnp.maximum(m_sc[...], s.max(-1, keepdims=True))
    alpha = jnp.exp(m_sc[...] - m_new)
    p = jnp.exp(s - m_new)
    l_sc[...] = alpha * l_sc[...] + p.sum(-1, keepdims=True)
    acc_sc[...] = alpha * acc_sc[...] + jnp.einsum(
        "bqk,bkd->bqd", p.astype(v_ref.dtype), v_ref[...],
        preferred_element_type=jnp.float32)
    m_sc[...] = m_new

    @pl.when(kv == pl.num_programs(1) - 1)
    def _():
        o_ref[...] = (acc_sc[...] *
                      pl.reciprocal(l_sc[...], approx=True)).astype(o_ref.dtype)


def mha_flash_attention(q, k, v, tq_pref=128, tk_pref=128):
    """q, k, v: (B*H, T, Dh) -> (B*H, T, Dh)."""
    BH, T, Dh = q.shape
    scale = Dh ** (-0.5)      # == (Dh^-0.25 on q) * (Dh^-0.25 on k), applied once
    tq = _pick_tile(T, tq_pref, 8)
    tk = _pick_tile(T, tk_pref, 8)
    return pl.pallas_call(
        functools.partial(_flash_attn_kernel, scale=scale),
        grid=(T // tq, T // tk),
        out_shape=jax.ShapeDtypeStruct((BH, T, Dh), q.dtype),
        in_specs=[
            pl.BlockSpec((BH, tq, Dh), lambda qi, ki: (0, qi, 0)),
            pl.BlockSpec((BH, tk, Dh), lambda qi, ki: (0, ki, 0)),
            pl.BlockSpec((BH, tk, Dh), lambda qi, ki: (0, ki, 0)),
        ],
        out_specs=pl.BlockSpec((BH, tq, Dh), lambda qi, ki: (0, qi, 0)),
        scratch_shapes=[pltpu.VMEM((BH, tq, 1), jnp.float32),
                        pltpu.VMEM((BH, tq, 1), jnp.float32),
                        pltpu.VMEM((BH, tq, Dh), jnp.float32)],
        compiler_params=pltpu.CompilerParams(
            dimension_semantics=("parallel", "arbitrary")),
    )(q, k, v)


# ----------------------------------------------------------------------------
# Kernel 3: matmul + bias + residual add  [attention out-projection]
# ----------------------------------------------------------------------------
def _matmul_bias_res_kernel(a_ref, w_ref, b_ref, r_ref, o_ref):
    y = jnp.dot(a_ref[...], w_ref[...], preferred_element_type=jnp.float32)
    o_ref[...] = (y + b_ref[...] + r_ref[...]).astype(o_ref.dtype)


def matmul_bias_residual(a, w, bias, resid, tm_pref=256, tn_pref=256):
    M, K = a.shape
    N = w.shape[1]
    tm = _pick_tile(M, tm_pref, 8)
    tn = _pick_tile(N, tn_pref, 128)
    return pl.pallas_call(
        _matmul_bias_res_kernel,
        grid=(M // tm, N // tn),
        out_shape=jax.ShapeDtypeStruct((M, N), jnp.float32),
        in_specs=[
            pl.BlockSpec((tm, K), lambda m, n: (m, 0)),
            pl.BlockSpec((K, tn), lambda m, n: (0, n)),
            pl.BlockSpec((1, tn), lambda m, n: (0, n)),
            pl.BlockSpec((tm, tn), lambda m, n: (m, n)),
        ],
        out_specs=pl.BlockSpec((tm, tn), lambda m, n: (m, n)),
        compiler_params=pltpu.CompilerParams(
            dimension_semantics=("parallel", "parallel")),
    )(a, w, bias, resid)


# ----------------------------------------------------------------------------
# Kernel 4: fused LayerNorm -> fc1 + GELU -> fc2 + residual (4C dim tiled)
# ----------------------------------------------------------------------------
def _ln_mlp_res_kernel(x_ref, g_ref, b_ref, w1_ref, b1_ref, w2_ref, b2_ref,
                       o_ref, xln_sc, acc_sc, *, eps):
    h = pl.program_id(1)

    @pl.when(h == 0)
    def _():
        x = x_ref[...]
        mu = jnp.mean(x, axis=-1, keepdims=True)
        xc = x - mu
        var = jnp.mean(xc * xc, axis=-1, keepdims=True)
        xn = xc * jax.lax.rsqrt(var + eps) * g_ref[...] + b_ref[...]
        xln_sc[...] = xn.astype(xln_sc.dtype)
        acc_sc[...] = jnp.zeros_like(acc_sc)

    hid = jnp.dot(xln_sc[...], w1_ref[...],
                  preferred_element_type=jnp.float32) + b1_ref[...]
    hid = _gelu(hid).astype(w2_ref.dtype)
    acc_sc[...] += jnp.dot(hid, w2_ref[...], preferred_element_type=jnp.float32)

    @pl.when(h == pl.num_programs(1) - 1)
    def _():
        o_ref[...] = (acc_sc[...] + b2_ref[...] + x_ref[...]).astype(o_ref.dtype)


def ln_mlp_residual(x, g, b, w1, b1, w2, b2, eps=1e-5, tm_pref=256, th_pref=512):
    M, C = x.shape
    Hd = w1.shape[1]
    tm = _pick_tile(M, tm_pref, 8)
    th = _pick_tile(Hd, th_pref, 128)
    return pl.pallas_call(
        functools.partial(_ln_mlp_res_kernel, eps=eps),
        grid=(M // tm, Hd // th),
        out_shape=jax.ShapeDtypeStruct((M, C), jnp.float32),
        in_specs=[
            pl.BlockSpec((tm, C), lambda m, h: (m, 0)),
            pl.BlockSpec((1, C), lambda m, h: (0, 0)),
            pl.BlockSpec((1, C), lambda m, h: (0, 0)),
            pl.BlockSpec((C, th), lambda m, h: (0, h)),
            pl.BlockSpec((1, th), lambda m, h: (0, h)),
            pl.BlockSpec((th, C), lambda m, h: (h, 0)),
            pl.BlockSpec((1, C), lambda m, h: (0, 0)),
        ],
        out_specs=pl.BlockSpec((tm, C), lambda m, h: (m, 0)),
        scratch_shapes=[pltpu.VMEM((tm, C), w1.dtype),
                        pltpu.VMEM((tm, C), jnp.float32)],
        compiler_params=pltpu.CompilerParams(
            dimension_semantics=("parallel", "arbitrary")),
    )(x, g, b, w1, b1, w2, b2)


# ----------------------------------------------------------------------------
# parameters: raw (PyTorch layout) -> prepared (fused / transposed / cast once)
# ----------------------------------------------------------------------------
def init_raw_params(key, n_state):
    keys = iter(jax.random.split(key, 32))

    def nrm(shape, scale=0.05):
        return scale * jax.random.normal(next(keys), shape, dtype=jnp.float32)

    C = n_state
    return {
        "attn_ln_g": jnp.ones((C,), jnp.float32),
        "attn_ln_b": jnp.zeros((C,), jnp.float32),
        "q_w": nrm((C, C)), "q_b": nrm((C,)),
        "k_w": nrm((C, C)),                       # key Linear has no bias
        "v_w": nrm((C, C)), "v_b": nrm((C,)),
        "o_w": nrm((C, C)), "o_b": nrm((C,)),
        "mlp_ln_g": jnp.ones((C,), jnp.float32),
        "mlp_ln_b": jnp.zeros((C,), jnp.float32),
        "fc1_w": nrm((4 * C, C)), "fc1_b": nrm((4 * C,)),
        "fc2_w": nrm((C, 4 * C)), "fc2_b": nrm((C,)),
    }


def prepare_params(raw, compute_dtype=jnp.bfloat16):
    """One-time layout plumbing: transpose to (in,out), fuse Q/K/V, cast to bf16."""
    C = raw["q_w"].shape[0]
    w_qkv = jnp.concatenate([raw["q_w"].T, raw["k_w"].T, raw["v_w"].T], axis=1)
    b_qkv = jnp.concatenate(
        [raw["q_b"], jnp.zeros((C,), jnp.float32), raw["v_b"]])
    return {
        "attn_ln_g": raw["attn_ln_g"].reshape(1, C),
        "attn_ln_b": raw["attn_ln_b"].reshape(1, C),
        "w_qkv": w_qkv.astype(compute_dtype),
        "b_qkv": b_qkv.reshape(1, 3 * C),
        "w_out": raw["o_w"].T.astype(compute_dtype),
        "b_out": raw["o_b"].reshape(1, C),
        "mlp_ln_g": raw["mlp_ln_g"].reshape(1, C),
        "mlp_ln_b": raw["mlp_ln_b"].reshape(1, C),
        "w_fc1": raw["fc1_w"].T.astype(compute_dtype),
        "b_fc1": raw["fc1_b"].reshape(1, 4 * C),
        "w_fc2": raw["fc2_w"].T.astype(compute_dtype),
        "b_fc2": raw["fc2_b"].reshape(1, C),
    }


# ----------------------------------------------------------------------------
# ResidualAttentionBlock forward (Pallas path)
# ----------------------------------------------------------------------------
def residual_attention_block(params, x, n_head):
    """x: (B, T, C) f32 -> (B, T, C) f32.  Self-attention only (mask=None,
    cross_attention=False, kv_cache=None), matching the module defaults."""
    B, T, C = x.shape
    H = n_head
    Dh = C // H
    M = B * T
    x2 = x.reshape(M, C).astype(jnp.float32)

    # --- attention sub-block: fused LN->QKV, flash attention, out-proj+residual
    qkv = ln_matmul(x2, params["attn_ln_g"], params["attn_ln_b"],
                    params["w_qkv"], params["b_qkv"],
                    out_dtype=params["w_qkv"].dtype)
    q, k, v = qkv[:, :C], qkv[:, C:2 * C], qkv[:, 2 * C:]

    def split_heads(t):
        return t.reshape(B, T, H, Dh).transpose(0, 2, 1, 3).reshape(B * H, T, Dh)

    a = mha_flash_attention(split_heads(q), split_heads(k), split_heads(v))
    a = a.reshape(B, H, T, Dh).transpose(0, 2, 1, 3).reshape(M, C)
    x2 = matmul_bias_residual(a, params["w_out"], params["b_out"], x2)

    # --- MLP sub-block: one fused kernel (LN -> fc1+GELU -> fc2 + residual)
    x2 = ln_mlp_residual(x2, params["mlp_ln_g"], params["mlp_ln_b"],
                         params["w_fc1"], params["b_fc1"],
                         params["w_fc2"], params["b_fc2"])
    return x2.reshape(B, T, C)


# ----------------------------------------------------------------------------
# pure-JAX reference mirroring the PyTorch forward
# ----------------------------------------------------------------------------
def ref_block(raw, x, n_head):
    C = x.shape[-1]
    H = n_head
    Dh = C // H

    def ln(t, g, b, eps=1e-5):
        mu = jnp.mean(t, -1, keepdims=True)
        var = jnp.mean((t - mu) ** 2, -1, keepdims=True)
        return (t - mu) / jnp.sqrt(var + eps) * g + b

    def lin(t, w, b=None):
        y = t @ w.T
        return y if b is None else y + b

    xl = ln(x, raw["attn_ln_g"], raw["attn_ln_b"])
    q = lin(xl, raw["q_w"], raw["q_b"])
    k = lin(xl, raw["k_w"])
    v = lin(xl, raw["v_w"], raw["v_b"])
    B, T, _ = q.shape
    scale = Dh ** (-0.25)
    qh = q.reshape(B, T, H, Dh).transpose(0, 2, 1, 3) * scale
    kh = k.reshape(B, T, H, Dh).transpose(0, 2, 3, 1) * scale
    vh = v.reshape(B, T, H, Dh).transpose(0, 2, 1, 3)
    w_ = jax.nn.softmax(qh @ kh, axis=-1)
    a = (w_ @ vh).transpose(0, 2, 1, 3).reshape(B, T, C)
    x = x + lin(a, raw["o_w"], raw["o_b"])

    xl = ln(x, raw["mlp_ln_g"], raw["mlp_ln_b"])
    hid = jax.nn.gelu(lin(xl, raw["fc1_w"], raw["fc1_b"]), approximate=False)
    return x + lin(hid, raw["fc2_w"], raw["fc2_b"])


# ----------------------------------------------------------------------------
if __name__ == "__main__":
    # small shapes consistent with the module: seq=8, hidden n_state=32, 4 heads
    B, T, n_state, n_head = 2, 8, 32, 4

    key = jax.random.PRNGKey(0)
    kx, kp = jax.random.split(key)
    x = jax.random.normal(kx, (B, T, n_state), dtype=jnp.float32)
    raw = init_raw_params(kp, n_state)

    ref = jax.block_until_ready(ref_block(raw, x, n_head))

    # f32 MXU path: tight correctness check against the reference.
    out_f32 = jax.block_until_ready(
        residual_attention_block(prepare_params(raw, jnp.float32), x, n_head))
    assert out_f32.shape == (B, T, n_state)
    np.testing.assert_allclose(np.asarray(out_f32), np.asarray(ref),
                               atol=5e-3, rtol=5e-3)

    # bf16 MXU path (default deployment config): looser tolerance.
    out_bf16 = jax.block_until_ready(
        residual_attention_block(prepare_params(raw, jnp.bfloat16), x, n_head))
    assert out_bf16.shape == (B, T, n_state)
    np.testing.assert_allclose(np.asarray(out_bf16), np.asarray(ref),
                               atol=5e-2, rtol=5e-2)

    print("KERNEL_OK")
</pallas_src>

<mosaic_0001>
module attributes {stable_mosaic.version = 11 : i64} {
  func.func @_ln_matmul_kernel(%arg0: i32, %arg1: i32, %arg2: memref<16x32xf32, #tpu.memory_space<vmem>>, %arg3: memref<1x32xf32, #tpu.memory_space<vmem>>, %arg4: memref<1x32xf32, #tpu.memory_space<vmem>>, %arg5: memref<32x96xf32, #tpu.memory_space<vmem>>, %arg6: memref<1x96xf32, #tpu.memory_space<vmem>>, %arg7: memref<16x96xf32, #tpu.memory_space<vmem>>, %arg8: memref<16x32xf32, #tpu.memory_space<vmem>>) attributes {dimension_semantics = [#tpu.dimension_semantics<parallel>, #tpu.dimension_semantics<arbitrary>], iteration_bounds = array<i64: 1, 1>, scalar_prefetch = 0 : i64, scratch_operands = 1 : i64, tpu.core_type = #tpu.core_type<tc>, window_params = [{transform_indices = @transform_0, window_bounds = array<i64: 16, 32>}, {pipeline_mode = #tpu.pipeline_mode<synchronous>, transform_indices = @transform_1, window_bounds = array<i64: 1, 32>}, {pipeline_mode = #tpu.pipeline_mode<synchronous>, transform_indices = @transform_2, window_bounds = array<i64: 1, 32>}, {transform_indices = @transform_3, window_bounds = array<i64: 32, 96>}, {transform_indices = @transform_4, window_bounds = array<i64: 1, 96>}, {transform_indices = @transform_5, window_bounds = array<i64: 16, 96>}]} {
    %c0_i32 = arith.constant 0 : i32
    %0 = arith.cmpi eq, %arg1, %c0_i32 : i32
    %1 = arith.extui %0 : i1 to i32
    %c0_i32_0 = arith.constant 0 : i32
    %2 = arith.cmpi ne, %1, %c0_i32_0 : i32
    scf.if %2 {
      %c0_8 = arith.constant 0 : index
      %c0_9 = arith.constant 0 : index
      %10 = vector.load %arg2[%c0_8, %c0_9] : memref<16x32xf32, #tpu.memory_space<vmem>>, vector<16x32xf32>
      %cst_10 = arith.constant dense<0.000000e+00> : vector<16xf32>
      %11 = vector.multi_reduction <add>, %10, %cst_10 [1] : vector<16x32xf32> to vector<16xf32>
      %12 = vector.shape_cast %11 : vector<16xf32> to vector<16x1xf32>
      %cst_11 = arith.constant 3.200000e+01 : f32
      %13 = vector.broadcast %cst_11 : f32 to vector<16x1xf32>
      %14 = arith.divf %12, %13 : vector<16x1xf32>
      %15 = vector.broadcast %14 : vector<16x1xf32> to vector<16x32xf32>
      %16 = arith.subf %10, %15 : vector<16x32xf32>
      %17 = arith.mulf %16, %16 : vector<16x32xf32>
      %cst_12 = arith.constant dense<0.000000e+00> : vector<16xf32>
      %18 = vector.multi_reduction <add>, %17, %cst_12 [1] : vector<16x32xf32> to vector<16xf32>
      %19 = vector.shape_cast %18 : vector<16xf32> to vector<16x1xf32>
      %cst_13 = arith.constant 3.200000e+01 : f32
      %20 = vector.broadcast %cst_13 : f32 to vector<16x1xf32>
      %21 = arith.divf %19, %20 : vector<16x1xf32>
      %cst_14 = arith.constant 9.99999974E-6 : f32
      %22 = vector.broadcast %cst_14 : f32 to vector<16x1xf32>
      %23 = arith.addf %21, %22 : vector<16x1xf32>
      %24 = math.rsqrt %23 : vector<16x1xf32>
      %25 = vector.broadcast %24 : vector<16x1xf32> to vector<16x32xf32>
      %26 = arith.mulf %16, %25 : vector<16x32xf32>
      %c0_15 = arith.constant 0 : index
      %c0_16 = arith.constant 0 : index
      %27 = vector.load %arg3[%c0_15, %c0_16] : memref<1x32xf32, #tpu.memory_space<vmem>>, vector<1x32xf32>
      %28 = vector.broadcast %27 : vector<1x32xf32> to vector<16x32xf32>
      %29 = arith.mulf %26, %28 : vector<16x32xf32>
      %c0_17 = arith.constant 0 : index
      %c0_18 = arith.constant 0 : index
      %30 = vector.load %arg4[%c0_17, %c0_18] : memref<1x32xf32, #tpu.memory_space<vmem>>, vector<1x32xf32>
      %31 = vector.broadcast %30 : vector<1x32xf32> to vector<16x32xf32>
      %32 = arith.addf %29, %31 : vector<16x32xf32>
      %c0_19 = arith.constant 0 : index
      %c0_20 = arith.constant 0 : index
      %33 = vector.load %arg8[%c0_19, %c0_20] : memref<16x32xf32, #tpu.memory_space<vmem>>, vector<16x32xf32>
      tpu.vector_store %arg8[%c0_19, %c0_20], %32 {strides = array<i32>} : memref<16x32xf32, #tpu.memory_space<vmem>>, vector<16x32xf32>,
    } else {
    }
    %c0 = arith.constant 0 : index
    %c0_1 = arith.constant 0 : index
    %3 = vector.load %arg8[%c0, %c0_1] : memref<16x32xf32, #tpu.memory_space<vmem>>, vector<16x32xf32>
    %c0_2 = arith.constant 0 : index
    %c0_3 = arith.constant 0 : index
    %4 = vector.load %arg5[%c0_2, %c0_3] : memref<32x96xf32, #tpu.memory_space<vmem>>, vector<32x96xf32>
    %cst = arith.constant dense<0.000000e+00> : vector<16x96xf32>
    %5 = tpu.matmul %3, %4, %cst {dimension_numbers = #tpu.dot_dimension_numbers<[1], [0], [0], [1], [0, 0, 1, 1], [], []>} : vector<16x32xf32>, vector<32x96xf32>, vector<16x96xf32> -> vector<16x96xf32>
    %c0_4 = arith.constant 0 : index
    %c0_5 = arith.constant 0 : index
    %6 = vector.load %arg6[%c0_4, %c0_5] : memref<1x96xf32, #tpu.memory_space<vmem>>, vector<1x96xf32>
    %7 = vector.broadcast %6 : vector<1x96xf32> to vector<16x96xf32>
    %8 = arith.addf %5, %7 : vector<16x96xf32>
    %c0_6 = arith.constant 0 : index
    %c0_7 = arith.constant 0 : index
    %9 = vector.load %arg7[%c0_6, %c0_7] : memref<16x96xf32, #tpu.memory_space<vmem>>, vector<16x96xf32>
    tpu.vector_store %arg7[%c0_6, %c0_7], %8 {strides = array<i32>} : memref<16x96xf32, #tpu.memory_space<vmem>>, vector<16x96xf32>,
    return
  }
  func.func @transform_0(%arg0: i32, %arg1: i32) -> (i32, i32) {
    %c0_i32 = arith.constant 0 : i32
    %c0_i32_0 = arith.constant 0 : i32
    return %arg0, %c0_i32 : i32, i32
  }
  func.func @transform_1(%arg0: i32, %arg1: i32) -> (i32, i32) {
    %c0_i32 = arith.constant 0 : i32
    %c0_i32_0 = arith.constant 0 : i32
    %c0_i32_1 = arith.constant 0 : i32
    return %c0_i32, %c0_i32_0 : i32, i32
  }
  func.func @transform_2(%arg0: i32, %arg1: i32) -> (i32, i32) {
    %c0_i32 = arith.constant 0 : i32
    %c0_i32_0 = arith.constant 0 : i32
    %c0_i32_1 = arith.constant 0 : i32
    return %c0_i32, %c0_i32_0 : i32, i32
  }
  func.func @transform_3(%arg0: i32, %arg1: i32) -> (i32, i32) {
    %c0_i32 = arith.constant 0 : i32
    %c0_i32_0 = arith.constant 0 : i32
    return %c0_i32, %arg1 : i32, i32
  }
  func.func @transform_4(%arg0: i32, %arg1: i32) -> (i32, i32) {
    %c0_i32 = arith.constant 0 : i32
    %c0_i32_0 = arith.constant 0 : i32
    return %c0_i32, %arg1 : i32, i32
  }
  func.func @transform_5(%arg0: i32, %arg1: i32) -> (i32, i32) {
    %c0_i32 = arith.constant 0 : i32
    return %arg0, %arg1 : i32, i32
  }
}

</mosaic_0001>

<bundles_post_ra>
// kernel: tpu_custom_call.1
= control target key start
LH: loop header
LB: loop body
LE: loop exit
PB: predicated region body
PF: predicated region fallthrough
CT: control target
= control target key end

     0   :  { %10 = vsyncpa [#allocation4], 0  ;;  %s386_s0 = inlined_call_operand.hbm [shape: f32[16,32], index: 0, kind: input, shape index: {}]   ;;  %s387_s1 = inlined_call_operand.vmem [shape: f32[1,32], index: 1, kind: input, shape index: {}]   ;;  %s388_s2 = inlined_call_operand.vmem [shape: f32[1,32], index: 2, kind: input, shape index: {}]   ;;  %s389_s3 = inlined_call_operand.hbm [shape: f32[32,96], index: 3, kind: input, shape index: {}]   ;;  %s390_s4 = inlined_call_operand.vmem [shape: f32[1,96], index: 4, kind: input, shape index: {}]   ;;  %s391_s5 = inlined_call_operand.hbm [shape: f32[16,96], index: 5, kind: output, shape index: {}]  }
   0x1   :  { %11 = vsyncpa [#allocation7], 0 }
   0x2   :  { %12 = vsyncpa [#allocation5], 0  ;;  %s316_s18 = smov [#allocation3]  }
   0x3   :  { %s18_s19 = sshll.u32 %s316_s18, 4  ;;  %s19_s19 = int_to_ptr.vmem [resolvable:$true] %s18_s19 }
   0x4   :  { %s258_s20 = scalar_lea.vmem %s19_s19, 256  ;;  %p263_p1 = scmp.lt.s32.totalorder %s19_s19, %s19_s19 }
   0x5   :  { %p259_p0 = scmp.ne.s32.totalorder %s19_s19, %s258_s20  ;;  %p264_p2 = scmp.lt.s32.totalorder %s258_s20, %s258_s20 }
   0x7   :  { %p265_p3 = por %p264_p2, %p263_p1 }
   0x9   :  { %p266_p4 = pnand %p265_p3, %p259_p0 }
   0xb   :  { %269 = shalt.err (!%p266_p4)
}
   0xc   :  { %s317_s21 = smov 128   ;;  %s318_s22 = smov 8  }
   0xd   :  { %24 = dma.hbm_to_vmem [thread:$0]  %s386_s0, 256, %s19_s19, [#allocation4], %s317_s21, %s317_s21, %s318_s22  }
   0xe   :  { %s319_s25 = smov [#allocation6]  }
   0xf   :  { %s34_s26 = sshll.u32 %s319_s25, 4  ;;  %s35_s26 = int_to_ptr.vmem [resolvable:$true] %s34_s26 }
  0x10   :  { %s278_s27 = scalar_lea.vmem %s35_s26, 512  ;;  %p283_p6 = scmp.lt.s32.totalorder %s35_s26, %s35_s26 }
  0x11   :  { %p279_p5 = scmp.ne.s32.totalorder %s35_s26, %s278_s27  ;;  %p284_p7 = scmp.lt.s32.totalorder %s278_s27, %s278_s27 }
  0x13   :  { %p285_p8 = por %p284_p7, %p283_p6 }
  0x15   :  { %p286_p9 = pnand %p285_p8, %p279_p5 }
  0x17   :  { %289 = shalt.err (!%p286_p9)
}
  0x18   :  { %40 = dma.hbm_to_vmem [thread:$0]  %s389_s3, 512, %s35_s26, [#allocation7], %s317_s21, %s317_s21, %s318_s22  }
  0x19   :  { %310 = dma.done.wait [#allocation4], 256  }
  0x1a   :  { %311 = vsyncadd [#allocation4], 4294967040 }
  0x1b   :  { %312 = dma.done.wait [#allocation7], 512  }
  0x1c   :  { %313 = vsyncadd [#allocation7], 4294966784  ;;  %vm55_vm0 = vcmask 261120   ;;  %v53_v0 = vld [vmem:[#allocation3] sm:$0xff]  ;;  %v54_v1 = vld [vmem:[#allocation3 + $0x8] sm:$0xff]  ;;  %vm198_vm1 = vcmask 785408  }
  0x1d   :  { %v56_v2 = vsel %vm55_vm0, %v53_v0, 0.0  ;;  %v59_v3 = vsel %vm55_vm0, %v54_v1, 0.0  ;;  %v108_v14 = vld [vmem:[#allocation6 + $0x18] sm:$0xff]  ;;  %v107_v15 = vld [vmem:[#allocation6 + $0x10] sm:$0xff]  ;;  %v106_v16 = vld [vmem:[#allocation6 + $0x8] sm:$0xff] }
  0x1e   :  { %57 = vadd.xlane.f32.xlu0 %v56_v2  ;;  %230 = vmatprep.subr.mxu0 %v108_v14  ;;  %v105_v17 = vld [vmem:[#allocation6] sm:$0xff] }
  0x1f   :  { %231 = vmatpush3.msra.mxu0 %v108_v14  ;;  %v219_v25 = vld [vmem:[%s387_s1] ss:$0 sm:$0xff] }
  0x20   :  { %232 = vmatprep.subr.mxu0 %v107_v15  ;;  %v220_v27 = vld [vmem:[%s388_s2] ss:$0 sm:$0xff]  ;;  %s320_s2 = smov [#allocation8]  }
  0x21   :  { %233 = vmatpush3.msra.mxu0 %v107_v15  ;;  %v221_v36 = vld [vmem:[%s390_s4] ss:$0 sm:$0xff]  ;;  %s206_s8 = sshll.u32 %s320_s2, 4  ;;  %s207_s8 = int_to_ptr.vmem [resolvable:$true] %s206_s8 }
  0x22   :  { %60 = vadd.xlane.f32.xlu0 %v59_v3  ;;  %234 = vmatprep.subr.mxu0 %v106_v16  ;;  %s290_s9 = scalar_lea.vmem %s207_s8, 256  ;;  %p295_p11 = scmp.lt.s32.totalorder %s207_s8, %s207_s8 }
  0x23   :  { %235 = vmatpush3.msra.mxu0 %v106_v16  ;;  %p291_p10 = scmp.ne.s32.totalorder %s207_s8, %s290_s9  ;;  %p296_p12 = scmp.lt.s32.totalorder %s290_s9, %s290_s9 }
  0x24   :  { %236 = vmatprep.subr.mxu0 %v105_v17 }
  0x25   :  { %237 = vmatpush3.msra.mxu0 %v105_v17  ;;  %p297_p13 = por %p296_p12, %p295_p11 }
  0x27   :  { %p298_p0 = pnand %p297_p13, %p291_p10 }
  0xa7   :  { %v58_v4 = vpop.xlane.xlu0 %57 }
  0xa8   :  { %v63_v5 = vmul.f32 0.03125, %v58_v4 }
  0xaa   :  { %v65_v6 = vsub.f32 %v53_v0, %v63_v5 }
  0xab   :  { %v61_v7 = vpop.xlane.xlu0 %60 }
  0xac   :  { %v64_v8 = vmul.f32 0.03125, %v61_v7  ;;  %v67_v9 = vmul.f32 %v65_v6, %v65_v6 }
  0xae   :  { %v66_v10 = vsub.f32 %v54_v1, %v64_v8  ;;  %v69_v11 = vsel %vm55_vm0, %v67_v9, 0.0 }
  0xaf   :  { %70 = vadd.xlane.f32.xlu1 %v69_v11 }
  0xb0   :  { %v68_v12 = vmul.f32 %v66_v10, %v66_v10 }
  0xb2   :  { %v72_v13 = vsel %vm55_vm0, %v68_v12, 0.0 }
  0xb3   :  { %73 = vadd.xlane.f32.xlu1 %v72_v13 }
 0x138   :  { %v71_v18 = vpop.xlane.xlu1 %70 }
 0x139   :  { %v75_v19 = vmul.f32 0.03125, %v71_v18 }
 0x13b   :  { %v77_v20 = vadd.f32 1e-05, %v75_v19 }
 0x13c   :  { %v74_v21 = vpop.xlane.xlu1 %73 }
 0x13d   :  { %246 = vrsqrt.f32 %v77_v20  ;;  %v76_v22 = vmul.f32 0.03125, %v74_v21 }
 0x13f   :  { %v78_v23 = vadd.f32 1e-05, %v76_v22 }
 0x141   :  { %248 = vrsqrt.f32 %v78_v23 }
 0x14a   :  { %v247_v24 = vpop.eup %246 }
 0x14b   :  { %v81_v26 = vmul.f32 %v247_v24, %v65_v6 }
 0x14d   :  { %v90_v28 = vmul.f32 %v219_v25, %v81_v26 }
 0x14e   :  { %v249_v29 = vpop.eup %248 }
 0x14f   :  { %v99_v30 = vadd.f32 %v220_v27, %v90_v28  ;;  %v82_v31 = vmul.f32 %v249_v29, %v66_v10 }
 0x151   :  { %101 = vst.msk [vmem:[#allocation2] sm:$0xff] %vm55_vm0, %v99_v30  ;;  %v91_v32 = vmul.f32 %v219_v25, %v82_v31 }
 0x153   :  { %v100_v33 = vadd.f32 %v220_v27, %v91_v32 }
 0x155   :  { %102 = vst.msk [vmem:[#allocation2 + $0x8] sm:$0xff] %vm55_vm0, %v100_v33 }
 0x158   :  { %v103_v34 = vld [vmem:[#allocation2] sm:$0xff] }
 0x159   :  { %238 = vmatprep.mubr.msk.f32.mxu0 %vm55_vm0, %v103_v34 }
 0x15c   :  { %v104_v35 = vld [vmem:[#allocation2 + $0x8] sm:$0xff] }
 0x15d   :  { %239 = vmatmul.mubr.msk.f32.vlgmr.msra.gmra.mxu0 %vm55_vm0, %v104_v35 }
 0x21d   :  { %v240_v37 = vpop.f32.mrf.mxu0 }
 0x21e   :  { %v195_v38 = vadd.f32 %v240_v37, %v221_v36 }
 0x21f   :  { %v189_v39 = vpop.f32.mrf.mxu0 }
 0x220   :  { %v190_v40 = vadd.f32 %v221_v36, %v189_v39  ;;  %200 = vst.msk [vmem:[#allocation8 + $0x8] sm:$0xff] %vm198_vm1, %v195_v38 }
 0x222   :  { %199 = vst.msk [vmem:[#allocation8] sm:$0xff] %vm198_vm1, %v190_v40 }
 0x223   :  { %301 = shalt.err (!%p298_p0)
}
 0x224   :  { %212 = dma.vmem_to_hbm [thread:$0]  %s207_s8, 256, %s391_s5, [#allocation5], %s317_s21, %s317_s21, %s318_s22  }
 0x225   :  { %314 = dma.done.wait [#allocation5], 256  }
 0x226   :  { %315 = vsyncadd [#allocation5], 4294967040 }
 0x227   :  { %216 = vsyncpa [#allocation4], 1 }
 0x228   :  { %217 = vsyncpa [#allocation7], 1 }
 0x229   :  { %218 = vsyncpa [#allocation5], 1 }

</bundles_post_ra>
